<compile_context>
chip_gen: v6e
topology: v6e:2x2x1
jax: 0.10.0
libtpu: 0.0.40
codegen_flags: <defaults>
</compile_context>

<pallas_src>
import functools

import jax
import jax.numpy as jnp
from jax import lax
from jax.experimental import pallas as pl
from jax.experimental.pallas import tpu as pltpu
import numpy as np

STRONG_PIXEL = 255.0
WEAK_PIXEL = 25.0
LOW_THRESHOLD = 0.05
HIGH_THRESHOLD = 0.15


# ------------------------------ small helpers --------------------------------

def _classify(x, high, low):
    """Exact torch assignment-order semantics: strong, then weak, then zero overwrite."""
    out = x
    out = jnp.where(x >= high, STRONG_PIXEL, out)
    out = jnp.where((x <= high) & (x >= low), WEAK_PIXEL, out)
    out = jnp.where(x < low, 0.0, out)
    return out


def _roll_r(x, d):
    """y[..., j] = x[..., j - d]  (bring the LEFT neighbour at distance d)."""
    return pltpu.roll(x, d, axis=x.ndim - 1)


def _roll_l(x, d):
    """y[..., j] = x[..., j + d]; pltpu.roll needs a non-negative shift, so rotate by W - d."""
    return pltpu.roll(x, x.shape[-1] - d, axis=x.ndim - 1)


def _band_rows(nrows, ncols):
    """~2 MiB f32 row-bands; multiple of 8 (cdiv grid + row masking handles remainders)."""
    target = max(8, ((2 * 1024 * 1024) // (ncols * 4)) // 8 * 8)
    if nrows <= target:
        return nrows          # full-dim block is always a legal block shape
    return target


def _vmem_cap_bytes():
    try:
        return int(pltpu.get_tpu_info().vmem_capacity_bytes)
    except Exception:
        return 64 * 1024 * 1024


# ----------------------- Pass 1: tiled global max ---------------------------

def _max_kernel(x_ref, m_ref, *, bm, nrows):
    @pl.when(pl.program_id(0) == 0)
    def _():
        m_ref[...] = jnp.full(m_ref.shape, -jnp.inf, m_ref.dtype)

    # Mask rows past the end of the array (partial last block contents are unspecified).
    row = lax.broadcasted_iota(jnp.int32, x_ref.shape, 0) + pl.program_id(0) * bm
    x = jnp.where(row < nrows, x_ref[...], -jnp.inf)
    m_ref[...] = jnp.maximum(m_ref[...], jnp.max(x, keepdims=True))


def _global_max(x):
    R, C = x.shape
    bm = _band_rows(R, C)
    return pl.pallas_call(
        functools.partial(_max_kernel, bm=bm, nrows=R),
        out_shape=jax.ShapeDtypeStruct((1, 1), jnp.float32),
        grid=(pl.cdiv(R, bm),),
        in_specs=[pl.BlockSpec((bm, C), lambda i: (i, 0))],
        out_specs=pl.BlockSpec((1, 1), lambda i: (0, 0)),
        compiler_params=pltpu.CompilerParams(dimension_semantics=("arbitrary",)),
    )(x)


# ----------------- Pass 2: tiled elementwise classification -----------------

def _classify_kernel(max_ref, x_ref, o_ref):
    high = max_ref[0, 0] * HIGH_THRESHOLD          # SMEM scalar, broadcast on the VPU
    low = high * LOW_THRESHOLD
    o_ref[...] = _classify(x_ref[...], high, low).astype(o_ref.dtype)


def _threshold_only(x, m):
    R, C = x.shape
    bm = _band_rows(R, C)
    return pl.pallas_call(
        _classify_kernel,
        out_shape=jax.ShapeDtypeStruct((R, C), jnp.float32),
        grid=(pl.cdiv(R, bm),),
        in_specs=[pl.BlockSpec(memory_space=pltpu.MemorySpace.SMEM),
                  pl.BlockSpec((bm, C), lambda i: (i, 0))],
        out_specs=pl.BlockSpec((bm, C), lambda i: (i, 0)),
        compiler_params=pltpu.CompilerParams(dimension_semantics=("parallel",)),
    )(m, x)


# --------- Fused max + classification + sequential hysteresis ----------------

def _hysteresis_kernel(x_ref, o_ref, a_ref, *, valid_w):
    H, Wp = x_ref.shape      # Wp = padded (multiple of 128) width
    W = valid_w              # real image width

    lane = lax.broadcasted_iota(jnp.int32, (1, Wp), 1)
    valid = lane < W
    interior = (lane >= 1) & (lane <= W - 2)          # columns touched by hysteresis

    # ---- fused global max (valid lanes only) + double threshold -------------
    x = x_ref[...]
    xmax = jnp.max(jnp.where(valid, x, -jnp.inf), keepdims=True)   # (1, 1)
    high = xmax * HIGH_THRESHOLD
    low = high * LOW_THRESHOLD
    classified = jnp.where(valid, _classify(x, high, low), 0.0)
    o_ref[...] = classified.astype(o_ref.dtype)

    # ---- full-occupancy precompute of the raw-neighbour strong plane --------
    # A[i, j] = 1 iff any of raw[i, j-1], raw[i, j], raw[i, j+1] == STRONG.
    # At weak pixels (raw != STRONG) this equals the same-row raw left/right contribution;
    # read at row i+1 it is exactly the below-row raw contribution (3 neighbours).
    a_plane = ((classified == STRONG_PIXEL)
               | (_roll_r(classified, 1) == STRONG_PIXEL)
               | (_roll_l(classified, 1) == STRONG_PIXEL))
    a_plane = jnp.where(a_plane, 1.0, 0.0)
    a_ref[...] = a_plane.astype(a_ref.dtype)

    # ---- hoisted Kogge-Stone lane masks (JAX does not CSE these) ------------
    scan_steps = []
    d = 1
    while d < W:
        scan_steps.append((d, lane >= d))
        d *= 2

    def row_body(i, carry):
        above, a_cur = carry                      # finalized row i-1, A[i]
        cur = o_ref[pl.ds(i, 1), :]               # raw thresholded row i
        a_below = a_ref[pl.ds(i + 1, 1), :]       # below-row raw contribution

        # Above row is already final (includes promotions): 2 lane rolls per row.
        above_contrib = ((above == STRONG_PIXEL)
                         | (_roll_r(above, 1) == STRONG_PIXEL)
                         | (_roll_l(above, 1) == STRONG_PIXEL))

        weak = (cur == WEAK_PIXEL) & interior
        # All strong-neighbour evidence that does NOT depend on this row's already-processed
        # left neighbour; a *promoted* left neighbour is handled by the scan below.
        seed = (a_cur > 0.5) | (a_below > 0.5) | above_contrib

        b = jnp.where(weak, 1.0, 0.0)             # can forward strongness left -> right
        a = jnp.where(weak & seed, 1.0, 0.0)      # strong without help from the left

        # Kogge-Stone scan of p[j] = a[j] | (b[j] & p[j-1])   (left -> right).
        for dd, m_dd in scan_steps:
            a_sh = jnp.where(m_dd, _roll_r(a, dd), 0.0)
            b_sh = jnp.where(m_dd, _roll_r(b, dd), 0.0)
            a = jnp.maximum(a, b * a_sh)
            b = b * b_sh

        promoted = a > 0.5
        new_row = jnp.where((cur == STRONG_PIXEL) | promoted, STRONG_PIXEL,
                            jnp.where(weak, 0.0, cur))
        o_ref[pl.ds(i, 1), :] = new_row.astype(o_ref.dtype)
        return new_row, a_below                   # carry finalized row + next A row

    init = (classified[0:1, :], a_plane[1:2, :])
    lax.fori_loop(1, H - 1, row_body, init)


# ------------------------------- wrapper -------------------------------------

def threshold_forward(img, hysteresis: bool = True):
    """img: (N, C, H, W). Only img[0, 0] is used, exactly like the PyTorch module."""
    x = img[0, 0].astype(jnp.float32)
    H, W = x.shape

    if (not hysteresis) or H < 3 or W < 3:
        # Hysteresis is a no-op for H < 3 or W < 3 (no interior pixels).
        flat = x.reshape((H * W) // 128, 128) if (H * W) % 128 == 0 else x
        m = _global_max(flat)
        out = _threshold_only(flat, m).reshape(H, W)
        return out[None, None, :, :]

    # Pad columns to a multiple of 128 so every per-row op is lane-dense; pad lanes are masked
    # out of the in-kernel max, never feed interior hysteresis columns, and are sliced off.
    # TODO(synk): DMA the valid (H, W) region straight into the padded output (pl.ANY input +
    # in-place classification) to drop this host pad and single-buffer the image in VMEM.
    Wp = ((W + 127) // 128) * 128
    x_p = jnp.pad(x, ((0, 0), (0, Wp - W))) if Wp != W else x

    plane = H * Wp * 4
    needed = 3 * plane + (4 << 20)                # input + output + neighbour plane + headroom
    vmem_bytes = int(min(max(needed, 32 << 20), _vmem_cap_bytes() - (4 << 20)))
    # TODO(synk): frames whose planes exceed VMEM need a row-band grid that carries the previous
    # band's last finalized row in a persistent VMEM scratch (prefetch next band behind the loop).

    out_p = pl.pallas_call(
        functools.partial(_hysteresis_kernel, valid_w=W),
        out_shape=jax.ShapeDtypeStruct((H, Wp), jnp.float32),
        in_specs=[pl.BlockSpec(memory_space=pltpu.MemorySpace.VMEM)],
        out_specs=pl.BlockSpec(memory_space=pltpu.MemorySpace.VMEM),
        scratch_shapes=[pltpu.VMEM((H, Wp), jnp.float32)],
        compiler_params=pltpu.CompilerParams(vmem_limit_bytes=vmem_bytes),
    )(x_p)

    return out_p[:, :W][None, None, :, :]


# ------------------------- NumPy reference (verification) --------------------

def _reference_forward(img_np, hysteresis=True):
    img = np.array(img_np[0, 0], dtype=np.float32)
    high = np.float32(img.max()) * np.float32(HIGH_THRESHOLD)
    low = high * np.float32(LOW_THRESHOLD)
    strong = img >= high
    weak = (img <= high) & (img >= low)
    zeros = img < low
    img[strong] = STRONG_PIXEL
    img[weak] = WEAK_PIXEL
    img[zeros] = 0.0
    if hysteresis:
        H, W = img.shape
        for i in range(1, H - 1):
            for j in range(1, W - 1):
                if img[i, j] == WEAK_PIXEL:
                    if (img[i + 1, j - 1] == STRONG_PIXEL or img[i + 1, j] == STRONG_PIXEL
                            or img[i + 1, j + 1] == STRONG_PIXEL or img[i, j - 1] == STRONG_PIXEL
                            or img[i, j + 1] == STRONG_PIXEL or img[i - 1, j - 1] == STRONG_PIXEL
                            or img[i - 1, j] == STRONG_PIXEL or img[i - 1, j + 1] == STRONG_PIXEL):
                        img[i, j] = STRONG_PIXEL
                    else:
                        img[i, j] = 0.0
    return img[None, None]


if __name__ == "__main__":
    key = jax.random.PRNGKey(0)
    img = jax.random.uniform(key, (2, 4, 16, 16), dtype=jnp.float32)

    out = jax.block_until_ready(threshold_forward(img, hysteresis=True))
    ref = _reference_forward(np.asarray(img), hysteresis=True)
    np.testing.assert_allclose(np.asarray(out), ref, rtol=0, atol=0)

    out_nh = jax.block_until_ready(threshold_forward(img, hysteresis=False))
    ref_nh = _reference_forward(np.asarray(img), hysteresis=False)
    np.testing.assert_allclose(np.asarray(out_nh), ref_nh, rtol=0, atol=0)

    print("KERNEL_OK")
</pallas_src>

<mosaic_0001>
module attributes {stable_mosaic.version = 11 : i64} {
  func.func @_hysteresis_kernel(%arg0: memref<16x128xf32, #tpu.memory_space<vmem>>, %arg1: memref<16x128xf32, #tpu.memory_space<vmem>>, %arg2: memref<16x128xf32, #tpu.memory_space<vmem>>) attributes {dimension_semantics = [], scalar_prefetch = 0 : i64, scratch_operands = 1 : i64, tpu.core_type = #tpu.core_type<tc>} {
    %0 = tpu.iota {dimensions = array<i32: 1>} : vector<1x128xi32>
    %c16_i32 = arith.constant 16 : i32
    %1 = vector.broadcast %c16_i32 : i32 to vector<1x128xi32>
    %2 = arith.cmpi slt, %0, %1 : vector<1x128xi32>
    %c1_i32 = arith.constant 1 : i32
    %3 = vector.broadcast %c1_i32 : i32 to vector<1x128xi32>
    %4 = arith.cmpi sge, %0, %3 : vector<1x128xi32>
    %c14_i32 = arith.constant 14 : i32
    %5 = vector.broadcast %c14_i32 : i32 to vector<1x128xi32>
    %6 = arith.cmpi sle, %0, %5 : vector<1x128xi32>
    %7 = arith.andi %4, %6 : vector<1x128xi1>
    %c0 = arith.constant 0 : index
    %c0_0 = arith.constant 0 : index
    %8 = vector.load %arg0[%c0, %c0_0] : memref<16x128xf32, #tpu.memory_space<vmem>>, vector<16x128xf32>
    %cst = arith.constant 0xFF800000 : f32
    %9 = vector.shape_cast %2 : vector<1x128xi1> to vector<1x128xi1>
    %10 = vector.broadcast %9 : vector<1x128xi1> to vector<16x128xi1>
    %11 = vector.broadcast %cst : f32 to vector<16x128xf32>
    %12 = arith.select %10, %8, %11 : vector<16x128xi1>, vector<16x128xf32>
    %13 = vector.shape_cast %12 : vector<16x128xf32> to vector<1x16x128xf32>
    %cst_1 = arith.constant dense<0xFF800000> : vector<1xf32>
    %14 = vector.multi_reduction <maximumf>, %13, %cst_1 [1, 2] : vector<1x16x128xf32> to vector<1xf32>
    %15 = vector.shape_cast %14 : vector<1xf32> to vector<1x1x1xf32>
    %16 = vector.extract %15[0, 0, 0] : f32 from vector<1x1x1xf32>
    %17 = vector.broadcast %16 : f32 to vector<1x1xf32>
    %cst_2 = arith.constant 1.500000e-01 : f32
    %18 = vector.broadcast %cst_2 : f32 to vector<1x1xf32>
    %19 = arith.mulf %17, %18 : vector<1x1xf32>
    %cst_3 = arith.constant 5.000000e-02 : f32
    %20 = vector.broadcast %cst_3 : f32 to vector<1x1xf32>
    %21 = arith.mulf %19, %20 : vector<1x1xf32>
    %22 = vector.broadcast %19 : vector<1x1xf32> to vector<16x128xf32>
    %23 = arith.cmpf oge, %8, %22 : vector<16x128xf32>
    %cst_4 = arith.constant 2.550000e+02 : f32
    %24 = vector.broadcast %cst_4 : f32 to vector<16x128xf32>
    %25 = arith.select %23, %24, %8 : vector<16x128xi1>, vector<16x128xf32>
    %26 = vector.broadcast %19 : vector<1x1xf32> to vector<16x128xf32>
    %27 = arith.cmpf ole, %8, %26 : vector<16x128xf32>
    %28 = vector.broadcast %21 : vector<1x1xf32> to vector<16x128xf32>
    %29 = arith.cmpf oge, %8, %28 : vector<16x128xf32>
    %30 = arith.andi %27, %29 : vector<16x128xi1>
    %cst_5 = arith.constant 2.500000e+01 : f32
    %31 = vector.broadcast %cst_5 : f32 to vector<16x128xf32>
    %32 = arith.select %30, %31, %25 : vector<16x128xi1>, vector<16x128xf32>
    %33 = vector.broadcast %21 : vector<1x1xf32> to vector<16x128xf32>
    %34 = arith.cmpf olt, %8, %33 : vector<16x128xf32>
    %cst_6 = arith.constant 0.000000e+00 : f32
    %35 = vector.broadcast %cst_6 : f32 to vector<16x128xf32>
    %36 = arith.select %34, %35, %32 : vector<16x128xi1>, vector<16x128xf32>
    %cst_7 = arith.constant 0.000000e+00 : f32
    %37 = vector.shape_cast %2 : vector<1x128xi1> to vector<1x128xi1>
    %38 = vector.broadcast %37 : vector<1x128xi1> to vector<16x128xi1>
    %39 = vector.broadcast %cst_7 : f32 to vector<16x128xf32>
    %40 = arith.select %38, %36, %39 : vector<16x128xi1>, vector<16x128xf32>
    %c0_8 = arith.constant 0 : index
    %c0_9 = arith.constant 0 : index
    %41 = vector.load %arg1[%c0_8, %c0_9] : memref<16x128xf32, #tpu.memory_space<vmem>>, vector<16x128xf32>
    tpu.vector_store %arg1[%c0_8, %c0_9], %40 {strides = array<i32>} : memref<16x128xf32, #tpu.memory_space<vmem>>, vector<16x128xf32>,
    %cst_10 = arith.constant 2.550000e+02 : f32
    %42 = vector.broadcast %cst_10 : f32 to vector<16x128xf32>
    %43 = arith.cmpf oeq, %40, %42 : vector<16x128xf32>
    %c1_i32_11 = arith.constant 1 : i32
    %44 = tpu.dynamic_rotate %40 by %c1_i32_11 dim 1 : vector<16x128xf32>, i32 -> vector<16x128xf32>
    %cst_12 = arith.constant 2.550000e+02 : f32
    %45 = vector.broadcast %cst_12 : f32 to vector<16x128xf32>
    %46 = arith.cmpf oeq, %44, %45 : vector<16x128xf32>
    %47 = arith.ori %43, %46 : vector<16x128xi1>
    %c127_i32 = arith.constant 127 : i32
    %48 = tpu.dynamic_rotate %40 by %c127_i32 dim 1 : vector<16x128xf32>, i32 -> vector<16x128xf32>
    %cst_13 = arith.constant 2.550000e+02 : f32
    %49 = vector.broadcast %cst_13 : f32 to vector<16x128xf32>
    %50 = arith.cmpf oeq, %48, %49 : vector<16x128xf32>
    %51 = arith.ori %47, %50 : vector<16x128xi1>
    %cst_14 = arith.constant 1.000000e+00 : f32
    %cst_15 = arith.constant 0.000000e+00 : f32
    %52 = vector.broadcast %cst_14 : f32 to vector<16x128xf32>
    %53 = vector.broadcast %cst_15 : f32 to vector<16x128xf32>
    %54 = arith.select %51, %52, %53 : vector<16x128xi1>, vector<16x128xf32>
    %c0_16 = arith.constant 0 : index
    %c0_17 = arith.constant 0 : index
    %55 = vector.load %arg2[%c0_16, %c0_17] : memref<16x128xf32, #tpu.memory_space<vmem>>, vector<16x128xf32>
    tpu.vector_store %arg2[%c0_16, %c0_17], %54 {strides = array<i32>} : memref<16x128xf32, #tpu.memory_space<vmem>>, vector<16x128xf32>,
    %c1_i32_18 = arith.constant 1 : i32
    %56 = vector.broadcast %c1_i32_18 : i32 to vector<1x128xi32>
    %57 = arith.cmpi sge, %0, %56 : vector<1x128xi32>
    %c2_i32 = arith.constant 2 : i32
    %58 = vector.broadcast %c2_i32 : i32 to vector<1x128xi32>
    %59 = arith.cmpi sge, %0, %58 : vector<1x128xi32>
    %c4_i32 = arith.constant 4 : i32
    %60 = vector.broadcast %c4_i32 : i32 to vector<1x128xi32>
    %61 = arith.cmpi sge, %0, %60 : vector<1x128xi32>
    %c8_i32 = arith.constant 8 : i32
    %62 = vector.broadcast %c8_i32 : i32 to vector<1x128xi32>
    %63 = arith.cmpi sge, %0, %62 : vector<1x128xi32>
    %64 = vector.extract_strided_slice %40 {offsets = [0, 0], sizes = [1, 128], strides = [1, 1]} : vector<16x128xf32> to vector<1x128xf32>
    %65 = vector.extract_strided_slice %54 {offsets = [1, 0], sizes = [1, 128], strides = [1, 1]} : vector<16x128xf32> to vector<1x128xf32>
    %c1_i32_19 = arith.constant 1 : i32
    %c14_i32_20 = arith.constant 14 : i32
    %66 = arith.addi %c1_i32_19, %c14_i32_20 : i32
    %c1_i32_21 = arith.constant 1 : i32
    %67:2 = scf.for %arg3 = %c1_i32_19 to %66 step %c1_i32_21 iter_args(%arg4 = %64, %arg5 = %65) -> (vector<1x128xf32>, vector<1x128xf32>)  : i32 {
      %68 = arith.index_cast %arg3 : i32 to index
      %c0_23 = arith.constant 0 : index
      %69 = vector.load %arg1[%68, %c0_23] : memref<16x128xf32, #tpu.memory_space<vmem>>, vector<1x128xf32>
      %c1_i32_24 = arith.constant 1 : i32
      %70 = arith.addi %arg3, %c1_i32_24 : i32
      %71 = arith.index_cast %70 : i32 to index
      %c0_25 = arith.constant 0 : index
      %72 = vector.load %arg2[%71, %c0_25] : memref<16x128xf32, #tpu.memory_space<vmem>>, vector<1x128xf32>
      %cst_26 = arith.constant 2.550000e+02 : f32
      %73 = vector.broadcast %cst_26 : f32 to vector<1x128xf32>
      %74 = arith.cmpf oeq, %arg4, %73 : vector<1x128xf32>
      %c1_i32_27 = arith.constant 1 : i32
      %75 = tpu.dynamic_rotate %arg4 by %c1_i32_27 dim 1 : vector<1x128xf32>, i32 -> vector<1x128xf32>
      %cst_28 = arith.constant 2.550000e+02 : f32
      %76 = vector.broadcast %cst_28 : f32 to vector<1x128xf32>
      %77 = arith.cmpf oeq, %75, %76 : vector<1x128xf32>
      %78 = arith.ori %74, %77 : vector<1x128xi1>
      %c127_i32_29 = arith.constant 127 : i32
      %79 = tpu.dynamic_rotate %arg4 by %c127_i32_29 dim 1 : vector<1x128xf32>, i32 -> vector<1x128xf32>
      %cst_30 = arith.constant 2.550000e+02 : f32
      %80 = vector.broadcast %cst_30 : f32 to vector<1x128xf32>
      %81 = arith.cmpf oeq, %79, %80 : vector<1x128xf32>
      %82 = arith.ori %78, %81 : vector<1x128xi1>
      %cst_31 = arith.constant 2.500000e+01 : f32
      %83 = vector.broadcast %cst_31 : f32 to vector<1x128xf32>
      %84 = arith.cmpf oeq, %69, %83 : vector<1x128xf32>
      %85 = arith.andi %84, %7 : vector<1x128xi1>
      %cst_32 = arith.constant 5.000000e-01 : f32
      %86 = vector.broadcast %cst_32 : f32 to vector<1x128xf32>
      %87 = arith.cmpf ogt, %arg5, %86 : vector<1x128xf32>
      %cst_33 = arith.constant 5.000000e-01 : f32
      %88 = vector.broadcast %cst_33 : f32 to vector<1x128xf32>
      %89 = arith.cmpf ogt, %72, %88 : vector<1x128xf32>
      %90 = arith.ori %87, %89 : vector<1x128xi1>
      %91 = arith.ori %90, %82 : vector<1x128xi1>
      %cst_34 = arith.constant 1.000000e+00 : f32
      %cst_35 = arith.constant 0.000000e+00 : f32
      %92 = vector.broadcast %cst_34 : f32 to vector<1x128xf32>
      %93 = vector.broadcast %cst_35 : f32 to vector<1x128xf32>
      %94 = arith.select %85, %92, %93 : vector<1x128xi1>, vector<1x128xf32>
      %95 = arith.andi %85, %91 : vector<1x128xi1>
      %cst_36 = arith.constant 1.000000e+00 : f32
      %cst_37 = arith.constant 0.000000e+00 : f32
      %96 = vector.broadcast %cst_36 : f32 to vector<1x128xf32>
      %97 = vector.broadcast %cst_37 : f32 to vector<1x128xf32>
      %98 = arith.select %95, %96, %97 : vector<1x128xi1>, vector<1x128xf32>
      %c1_i32_38 = arith.constant 1 : i32
      %99 = tpu.dynamic_rotate %98 by %c1_i32_38 dim 1 : vector<1x128xf32>, i32 -> vector<1x128xf32>
      %cst_39 = arith.constant 0.000000e+00 : f32
      %100 = vector.broadcast %cst_39 : f32 to vector<1x128xf32>
      %101 = arith.select %57, %99, %100 : vector<1x128xi1>, vector<1x128xf32>
      %c1_i32_40 = arith.constant 1 : i32
      %102 = tpu.dynamic_rotate %94 by %c1_i32_40 dim 1 : vector<1x128xf32>, i32 -> vector<1x128xf32>
      %cst_41 = arith.constant 0.000000e+00 : f32
      %103 = vector.broadcast %cst_41 : f32 to vector<1x128xf32>
      %104 = arith.select %57, %102, %103 : vector<1x128xi1>, vector<1x128xf32>
      %105 = arith.mulf %94, %101 : vector<1x128xf32>
      %106 = arith.maximumf %98, %105 : vector<1x128xf32>
      %107 = arith.mulf %94, %104 : vector<1x128xf32>
      %c2_i32_42 = arith.constant 2 : i32
      %108 = tpu.dynamic_rotate %106 by %c2_i32_42 dim 1 : vector<1x128xf32>, i32 -> vector<1x128xf32>
      %cst_43 = arith.constant 0.000000e+00 : f32
      %109 = vector.broadcast %cst_43 : f32 to vector<1x128xf32>
      %110 = arith.select %59, %108, %109 : vector<1x128xi1>, vector<1x128xf32>
      %c2_i32_44 = arith.constant 2 : i32
      %111 = tpu.dynamic_rotate %107 by %c2_i32_44 dim 1 : vector<1x128xf32>, i32 -> vector<1x128xf32>
      %cst_45 = arith.constant 0.000000e+00 : f32
      %112 = vector.broadcast %cst_45 : f32 to vector<1x128xf32>
      %113 = arith.select %59, %111, %112 : vector<1x128xi1>, vector<1x128xf32>
      %114 = arith.mulf %107, %110 : vector<1x128xf32>
      %115 = arith.maximumf %106, %114 : vector<1x128xf32>
      %116 = arith.mulf %107, %113 : vector<1x128xf32>
      %c4_i32_46 = arith.constant 4 : i32
      %117 = tpu.dynamic_rotate %115 by %c4_i32_46 dim 1 : vector<1x128xf32>, i32 -> vector<1x128xf32>
      %cst_47 = arith.constant 0.000000e+00 : f32
      %118 = vector.broadcast %cst_47 : f32 to vector<1x128xf32>
      %119 = arith.select %61, %117, %118 : vector<1x128xi1>, vector<1x128xf32>
      %c4_i32_48 = arith.constant 4 : i32
      %120 = tpu.dynamic_rotate %116 by %c4_i32_48 dim 1 : vector<1x128xf32>, i32 -> vector<1x128xf32>
      %cst_49 = arith.constant 0.000000e+00 : f32
      %121 = vector.broadcast %cst_49 : f32 to vector<1x128xf32>
      %122 = arith.select %61, %120, %121 : vector<1x128xi1>, vector<1x128xf32>
      %123 = arith.mulf %116, %119 : vector<1x128xf32>
      %124 = arith.maximumf %115, %123 : vector<1x128xf32>
      %125 = arith.mulf %116, %122 : vector<1x128xf32>
      %c8_i32_50 = arith.constant 8 : i32
      %126 = tpu.dynamic_rotate %124 by %c8_i32_50 dim 1 : vector<1x128xf32>, i32 -> vector<1x128xf32>
      %cst_51 = arith.constant 0.000000e+00 : f32
      %127 = vector.broadcast %cst_51 : f32 to vector<1x128xf32>
      %128 = arith.select %63, %126, %127 : vector<1x128xi1>, vector<1x128xf32>
      %129 = arith.mulf %125, %128 : vector<1x128xf32>
      %130 = arith.maximumf %124, %129 : vector<1x128xf32>
      %cst_52 = arith.constant 5.000000e-01 : f32
      %131 = vector.broadcast %cst_52 : f32 to vector<1x128xf32>
      %132 = arith.cmpf ogt, %130, %131 : vector<1x128xf32>
      %cst_53 = arith.constant 2.550000e+02 : f32
      %133 = vector.broadcast %cst_53 : f32 to vector<1x128xf32>
      %134 = arith.cmpf oeq, %69, %133 : vector<1x128xf32>
      %135 = arith.ori %134, %132 : vector<1x128xi1>
      %cst_54 = arith.constant 0.000000e+00 : f32
      %136 = vector.broadcast %cst_54 : f32 to vector<1x128xf32>
      %137 = arith.select %85, %136, %69 : vector<1x128xi1>, vector<1x128xf32>
      %cst_55 = arith.constant 2.550000e+02 : f32
      %138 = vector.broadcast %cst_55 : f32 to vector<1x128xf32>
      %139 = arith.select %135, %138, %137 : vector<1x128xi1>, vector<1x128xf32>
      %140 = arith.index_cast %arg3 : i32 to index
      %c0_56 = arith.constant 0 : index
      %141 = vector.load %arg1[%140, %c0_56] : memref<16x128xf32, #tpu.memory_space<vmem>>, vector<1x128xf32>
      tpu.vector_store %arg1[%140, %c0_56], %139 {strides = array<i32>} : memref<16x128xf32, #tpu.memory_space<vmem>>, vector<1x128xf32>,
      scf.yield %139, %72 : vector<1x128xf32>, vector<1x128xf32>
    }
    %c14_i32_22 = arith.constant 14 : i32
    return
  }
}

</mosaic_0001>

<bundles_post_ra>
// kernel: tpu_custom_call.1
= control target key start
LH: loop header
LB: loop body
LE: loop exit
PB: predicated region body
PF: predicated region fallthrough
CT: control target
= control target key end

     0   :  { %6 = vsyncpa [#allocation4], 0  ;;  %s411_s0 = inlined_call_operand.hbm [shape: f32[16,128], index: 0, kind: input, shape index: {}]   ;;  %s412_s1 = inlined_call_operand.hbm [shape: f32[16,128], index: 1, kind: output, shape index: {}]  }
   0x1   :  { %7 = vsyncpa [#allocation5], 0  ;;  %s304_s6 = smov [#allocation3]  }
   0x2   :  { %s13_s7 = sshll.u32 %s304_s6, 4  ;;  %s14_s7 = int_to_ptr.vmem [resolvable:$true] %s13_s7 }
   0x3   :  { %s244_s8 = scalar_lea.vmem %s14_s7, 256  ;;  %p249_p1 = scmp.lt.s32.totalorder %s14_s7, %s14_s7 }
   0x4   :  { %p245_p0 = scmp.ne.s32.totalorder %s14_s7, %s244_s8  ;;  %p250_p2 = scmp.lt.s32.totalorder %s244_s8, %s244_s8 }
   0x6   :  { %p251_p3 = por %p250_p2, %p249_p1 }
   0x8   :  { %p252_p4 = pnand %p251_p3, %p245_p0 }
   0xa   :  { %255 = shalt.err (!%p252_p4)
}
   0xb   :  { %s305_s9 = smov 128   ;;  %s306_s10 = smov 8  }
   0xc   :  { %19 = dma.hbm_to_vmem [thread:$0]  %s411_s0, 256, %s14_s7, [#allocation4], %s305_s9, %s305_s9, %s306_s10  }
   0xd   :  { %288 = dma.done.wait [#allocation4], 256  }
   0xe   :  { %289 = vsyncadd [#allocation4], 4294967040  ;;  %v23_v0 = vlaneseq  ;;  %v29_v3 = vld [vmem:[#allocation3] sm:$0xff]  ;;  %v30_v4 = vld [vmem:[#allocation3 + $0x8] sm:$0xff]  ;;  %s307_s13 = smov 1   ;;  %s308_s14 = smov 127  }
   0xf   :  { %v309_v29 = vmov 0.0   ;;  %s359_s15 = smov 1  }
  0x10   :  { %v333_v1 = vand.u32 127, %v23_v0 }
  0x12   :  { %vm26_vm0 = vcmp.ge.s32.totalorder %v333_v1, 1  ;;  %vm27_vm1 = vcmp.le.s32.totalorder %v333_v1, 14  ;;  %vm90_vm2 = vcmp.ge.s32.totalorder %v333_v1, 2  ;;  %vm25_vm3 = vcmp.lt.s32.totalorder %v333_v1, 16 }
  0x13   :  { %vm341_vm4 = vmand %vm26_vm0, %vm27_vm1  ;;  %vm91_vm5 = vcmp.ge.s32.totalorder %v333_v1, 4  ;;  %v33_v5 = vsel %vm25_vm3, %v29_v3, -inf  ;;  %v34_v6 = vsel %vm25_vm3, %v30_v4, -inf }
  0x14   :  { %v35_v7 = vmax.f32 %v33_v5, %v34_v6 }
  0x16   :  { %36 = vmax.xlane.f32.xlu0 %v35_v7 }
  0x9f   :  { %v37_v8 = vpop.xlane.xlu0 %36 }
  0xa0   :  { %v38_v9 = vrot.slane %v37_v8, 4 }
  0xa2   :  { %v39_v10 = vmax.f32 %v37_v8, %v38_v9 }
  0xa4   :  { %v40_v11 = vrot.slane %v39_v10, 2 }
  0xa6   :  { %v41_v12 = vmax.f32 %v39_v10, %v40_v11 }
  0xa8   :  { %v42_v13 = vrot.slane %v41_v12, 1 }
  0xaa   :  { %v43_v14 = vmax.f32 %v41_v12, %v42_v13 }
  0xac   :  { %197 = vpush %v43_v14 }
  0xdd   :  { %s198_s0 = spop %197 }
  0xde   :  { %v45_v15 = vstv %s198_s0 }
  0xdf   :  { %v46_v16 = vmul.f32 0.15, %v45_v15 }
  0xe1   :  { %v47_v17 = vmul.f32 0.05, %v46_v16  ;;  %vm49_vm7 = vcmp.ge.f32.partialorder %v30_v4, %v46_v16  ;;  %vm48_vm8 = vcmp.ge.f32.partialorder %v29_v3, %v46_v16  ;;  %vm53_vm9 = vcmp.le.f32.partialorder %v30_v4, %v46_v16 }
  0xe2   :  { %v51_v18 = vsel %vm49_vm7, 255.0, %v30_v4  ;;  %vm52_vm13 = vcmp.le.f32.partialorder %v29_v3, %v46_v16  ;;  %v50_v20 = vsel %vm48_vm8, 255.0, %v29_v3 }
  0xe3   :  { %vm55_vm10 = vcmp.ge.f32.partialorder %v30_v4, %v47_v17  ;;  %vm54_vm11 = vcmp.ge.f32.partialorder %v29_v3, %v47_v17  ;;  %vm61_vm14 = vcmp.lt.f32.partialorder %v30_v4, %v47_v17  ;;  %vm60_vm1 = vcmp.lt.f32.partialorder %v29_v3, %v47_v17 }
  0xe4   :  { %vm57_vm12 = vmand %vm53_vm9, %vm55_vm10 }
  0xe5   :  { %v59_v19 = vsel %vm57_vm12, 25.0, %v51_v18  ;;  %vm56_vm15 = vmand %vm52_vm13, %vm54_vm11 }
  0xe6   :  { %v63_v21 = vsel %vm61_vm14, 0.0, %v59_v19  ;;  %v58_v22 = vsel %vm56_vm15, 25.0, %v50_v20 }
  0xe7   :  { %v65_v23 = vsel %vm25_vm3, %v63_v21, 0.0  ;;  %v62_v24 = vsel %vm60_vm1, 0.0, %v58_v22 }
  0xe8   :  { %72 = vrot.lane.b32.xlu1 %v65_v23, %s307_s13  ;;  %67 = vst [vmem:[#allocation6 + $0x8] sm:$0xff] %v65_v23  ;;  %v64_v25 = vsel %vm25_vm3, %v62_v24, 0.0   ;;  %vm69_vm13 = vcmp.eq.f32.partialorder %v65_v23, 255.0 }
  0xe9   :  { %70 = vrot.lane.b32.xlu0 %v64_v25, %s307_s13  ;;  %66 = vst [vmem:[#allocation6] sm:$0xff] %v64_v25  ;;  %vm68_vm8 = vcmp.eq.f32.partialorder %v64_v25, 255.0 }
  0xec   :  { %78 = vrot.lane.b32.xlu1 %v64_v25, %s308_s14 }
  0xf0   :  { %80 = vrot.lane.b32.xlu1 %v65_v23, %s308_s14 }
 0x15a   :  { %v73_v26 = vpop.permute.xlu1 %72 }
 0x15b   :  { %v71_v27 = vpop.permute.xlu0 %70  ;;  %vm75_vm11 = vcmp.eq.f32.partialorder %v73_v26, 255.0 }
 0x15c   :  { %vm74_vm7 = vcmp.eq.f32.partialorder %v71_v27, 255.0  ;;  %vm77_vm3 = vmor %vm69_vm13, %vm75_vm11 }
 0x15d   :  { %vm76_vm9 = vmor %vm68_vm8, %vm74_vm7 }
 0x15e   :  { %v79_v28 = vpop.permute.xlu1 %78 }
 0x15f   :  { %vm82_vm10 = vcmp.eq.f32.partialorder %v79_v28, 255.0 }
 0x160   :  { %vm84_vm12 = vmor %vm76_vm9, %vm82_vm10 }
 0x161   :  { %v86_v30 = vsel %vm84_vm12, 1.0, %v309_v29 }
 0x162   :  { %88 = vst [vmem:[#allocation2] sm:$0xff] %v86_v30  ;;  %v94_v31 = vrot.slane %v86_v30, 1   ;;  %v81_v32 = vpop.permute.xlu1 %80 }
 0x163   :  { %vm83_vm14 = vcmp.eq.f32.partialorder %v81_v32, 255.0 }
 0x164   :  { %vm85_vm15 = vmor %vm77_vm3, %vm83_vm14 }
 0x165   :  { %v87_v33 = vsel %vm85_vm15, 1.0, %v309_v29 }
 0x166   :  { %89 = vst [vmem:[#allocation2 + $0x8] sm:$0xff] %v87_v33 }
 0x167 LB: > { %s310_s16 = smov 1   ;;  %s311_s17 = smov 127   ;;  %vm120_vm7 = vcmp.gt.f32.partialorder %v294_v31, 0.5  ;;  %vm109_vm9 = vcmp.eq.f32.partialorder %v298_v25, 255.0  ;;  %v312_v39 = vmov 0.0   ;;  %s302_s15 = sphi %s359_s15, %s101_s15   ;;  %v298_v25 = vphi %v64_v25, %v163_v25   ;;  %v294_v31 = vphi %v94_v31, %v418_v31  }
 0x168   : > { %110 = vrot.lane.b32.xlu0 %v298_v25, %s310_s16  ;;  %s104_s18 = scalar_lea.vmem [#allocation6], %s302_s15  ;;  %s183_s19 = scalar_lea.vmem [#allocation2], %s302_s15 }
 0x169   : > { %v105_v34 = vld [vmem:[%s104_s18] sm:$0x1]  ;;  %s313_s20 = smov 2   ;;  %s314_s21 = smov 4  }
 0x16a   : > { %vm118_vm1 = vcmp.eq.f32.partialorder %v105_v34, 25.0  ;;  %s315_s22 = smov 8   ;;  %s101_s15 = sadd.s32 1, %s302_s15  }
 0x16b   : > { %vm372_vm11 = vmand %vm118_vm1, %vm341_vm4  ;;  %vm160_vm1 = vcmp.eq.f32.partialorder %v105_v34, 255.0  ;;  %p98_p5 = scmp.ge.s32.totalorder %s101_s15, 15  }
 0x16c   : > { %114 = vrot.lane.b32.xlu0 %v298_v25, %s311_s17  ;;  %v124_v41 = vsel %vm372_vm11, 1.0, %v312_v39  ;;  %v162_v5 = vsel %vm372_vm11, 0.0, %v105_v34  ;;  %s316_s23 = smov (%p98_p5), [#allocation6]  }
 0x16d   : > { %v196_v35 = vld [vmem:[%s183_s19 + $0x1] sm:$0x1]   ;;  %s170_s24 = sshll.u32 (%p98_p5), %s316_s23, 4  ;;  %s171_s24 = int_to_ptr.vmem [resolvable:$true] %s170_s24 }
 0x16e   : > { %vm121_vm8 = vcmp.gt.f32.partialorder %v196_v35, 0.5  ;;  %v418_v31 = vmov %v196_v35  ;;  %s256_s25 = scalar_lea.vmem (%p98_p5), %s171_s24, 256  ;;  %p261_p7 = scmp.lt.s32.totalorder (%p98_p5), %s171_s24, %s171_s24 }
 0x16f   : > { %vm122_vm12 = vmor %vm120_vm7, %vm121_vm8  ;;  %p257_p6 = scmp.ne.s32.totalorder (%p98_p5), %s171_s24, %s256_s25  ;;  %p262_p8 = scmp.lt.s32.totalorder (%p98_p5), %s256_s25, %s256_s25 }
 0x171   :  { %p263_p9 = por (%p98_p5), %p262_p8, %p261_p7 }
 0x173   :  { %p264_p10 = pnand (%p98_p5), %p263_p9, %p257_p6 }
 0x1da   : > { %v111_v36 = vpop.permute.xlu0 %110 }
 0x1db   : > { %vm112_vm10 = vcmp.eq.f32.partialorder %v111_v36, 255.0 }
 0x1dc   : > { %vm113_vm13 = vmor %vm109_vm9, %vm112_vm10 }
 0x1de   : > { %v115_v38 = vpop.permute.xlu0 %114 }
 0x1df   : > { %vm116_vm3 = vcmp.eq.f32.partialorder %v115_v38, 255.0 }
 0x1e0   : > { %vm117_vm14 = vmor %vm113_vm13, %vm116_vm3 }
 0x1e1   : > { %vm123_vm15 = vmor %vm122_vm12, %vm117_vm14 }
 0x1e2   : > { %vm125_vm6 = vmand %vm372_vm11, %vm123_vm15 }
 0x1e3   : > { %v126_v40 = vsel %vm125_vm6, 1.0, %v312_v39  ;;  %vm417_vm6 = vcmp.ge.s32.totalorder %v333_v1, 8 }
 0x1e4   : > { %127 = vrot.lane.b32.xlu1 %v126_v40, %s310_s16 }
 0x1e8   : > { %130 = vrot.lane.b32.xlu1 %v124_v41, %s310_s16 }
 0x256   : > { %v128_v42 = vpop.permute.xlu1 %127 }
 0x257   : > { %v129_v43 = vsel %vm26_vm0, %v128_v42, 0.0 }
 0x258   : > { %v133_v44 = vmul.f32 %v129_v43, %v124_v41 }
 0x25a   : > { %v134_v45 = vmax.f32 %v126_v40, %v133_v44  ;;  %v131_v46 = vpop.permute.xlu1 %130 }
 0x25b   : > { %v132_v47 = vsel %vm26_vm0, %v131_v46, 0.0 }
 0x25c   : > { %v135_v48 = vmul.f32 %v132_v47, %v124_v41  ;;  %136 = vrot.lane.b32.xlu0 %v134_v45, %s313_s20 }
 0x25e   : > { %139 = vrot.lane.b32.xlu1 %v135_v48, %s313_s20 }
 0x2ce   : > { %v137_v49 = vpop.permute.xlu0 %136 }
 0x2cf   : > { %v138_v50 = vsel %vm90_vm2, %v137_v49, 0.0 }
 0x2d0   : > { %v142_v51 = vmul.f32 %v138_v50, %v135_v48  ;;  %v140_v52 = vpop.permute.xlu1 %139 }
 0x2d1   : > { %v141_v53 = vsel %vm90_vm2, %v140_v52, 0.0 }
 0x2d2   : > { %v143_v54 = vmax.f32 %v134_v45, %v142_v51  ;;  %v144_v55 = vmul.f32 %v141_v53, %v135_v48 }
 0x2d4   : > { %148 = vrot.lane.b32.xlu1 %v144_v55, %s314_s21  ;;  %145 = vrot.lane.b32.xlu0 %v143_v54, %s314_s21 }
 0x346   : > { %v146_v56 = vpop.permute.xlu0 %145  ;;  %v149_v60 = vpop.permute.xlu1 %148 }
 0x347   : > { %v147_v57 = vsel %vm91_vm5, %v146_v56, 0.0  ;;  %v150_v61 = vsel %vm91_vm5, %v149_v60, 0.0 }
 0x348   : > { %v151_v58 = vmul.f32 %v147_v57, %v144_v55  ;;  %v153_v62 = vmul.f32 %v150_v61, %v144_v55 }
 0x34a   : > { %v152_v59 = vmax.f32 %v143_v54, %v151_v58 }
 0x34c   : > { %154 = vrot.lane.b32.xlu0 %v152_v59, %s315_s22 }
 0x3be   : > { %v155_v63 = vpop.permute.xlu0 %154 }
 0x3bf   : > { %v156_v0 = vsel %vm417_vm6, %v155_v63, 0.0 }
 0x3c0   : > { %v157_v3 = vmul.f32 %v156_v0, %v153_v62 }
 0x3c2   : > { %v158_v4 = vmax.f32 %v152_v59, %v157_v3 }
 0x3c3   :  { %100 = sbr.rel (!%p98_p5) target bundleno = 359 (0x167), region = 37 }
 0x3c4   : > { %vm159_vm7 = vcmp.gt.f32.partialorder %v158_v4, 0.5 }
 0x3c5   : > { %vm161_vm8 = vmor %vm160_vm1, %vm159_vm7 }
 0x3c6   : > { %v163_v25 = vsel %vm161_vm8, 255.0, %v162_v5  }
 0x3c7   : > { %164 = vst [vmem:[%s104_s18] sm:$0x1] %v163_v25 }
 0x3c8   :  { %267 = shalt.err (!%p264_p10)
}
 0x3c9   :  { %176 = dma.vmem_to_hbm [thread:$0]  %s171_s24, 256, %s412_s1, [#allocation5], %s305_s9, %s305_s9, %s306_s10  }
 0x3ca   :  { %290 = dma.done.wait [#allocation5], 256  }
 0x3cb   :  { %291 = vsyncadd [#allocation5], 4294967040 }
 0x3cc   :  { %180 = vsyncpa [#allocation4], 1 }
 0x3cd   :  { %181 = vsyncpa [#allocation5], 1 }

</bundles_post_ra>
